<compile_context>
chip_gen: v5e
topology: v5e:2x2
jax: 0.10.0
libtpu: 0.0.40
codegen_flags: <defaults>
</compile_context>

<pallas_src>
import functools

import jax
import jax.numpy as jnp
from jax import lax
from jax.experimental import pallas as pl
from jax.experimental.pallas import tpu as pltpu


def _round_up(a, b):
    return ((a + b - 1) // b) * b


def _loss_kernel(x_ref, t_ref, w_ref, inter_ref, denom_ref, ce_ref,
                 *, hw_valid, tiles_per_split, has_pad):
    """One (C, TR, 128) slab-tile of one batch element.

    Computes softmax over C, Dice partial sums and the weighted-CE partial sum,
    accumulating into lane-dense (C, 128)/(1, 128) output blocks (revisited across
    the row-tile reduction axis)."""
    i = pl.program_id(2)
    C, TR, L = x_ref.shape

    @pl.when(i == 0)
    def _():
        inter_ref[...] = jnp.zeros_like(inter_ref)
        denom_ref[...] = jnp.zeros_like(denom_ref)
        ce_ref[...] = jnp.zeros_like(ce_ref)

    t = t_ref[0]                                    # (TR, 128) int32 labels
    w = w_ref[0].astype(jnp.float32)                # (TR, 128) per-pixel CE weights
    xs = [x_ref[c].astype(jnp.float32) for c in range(C)]   # C dense (TR, 128) slabs

    if has_pad:
        # Columns past H*W (128-pad zeros or uninitialized boundary-block data) must not
        # contribute.  Mask x first so exp/log stay finite even on garbage data.
        tile_idx = pl.program_id(0) * tiles_per_split + i
        row = lax.broadcasted_iota(jnp.int32, (TR, L), 0)
        lane = lax.broadcasted_iota(jnp.int32, (TR, L), 1)
        valid = (tile_idx * TR + row) * L + lane < hw_valid    # (TR, 128) bool
        xs = [jnp.where(valid, xc, 0.0) for xc in xs]
        w = jnp.where(valid, w, 0.0)

    # --- softmax over channels: pure elementwise VPU/EUP work on dense slabs ----------
    m = xs[0]
    for c in range(1, C):
        m = jnp.maximum(m, xs[c])
    es = [jnp.exp(xc - m) for xc in xs]
    s = es[0]
    for c in range(1, C):
        s = s + es[c]
    inv_s = pl.reciprocal(s, approx=True)           # EUP
    inv_s = inv_s * (2.0 - s * inv_s)               # one Newton step -> ~exact f32
    if has_pad:
        inv_s = jnp.where(valid, inv_s, 0.0)        # zero softmax on padded columns
    log_s = jnp.log(s)

    # --- Dice partials + CE gather via selects (no bool->f32 convert + multiply) ------
    x_t = jnp.zeros_like(m)
    for c in range(C):
        soft_c = es[c] * inv_s                      # (TR, 128); 0 on padded columns
        hit = t == c
        if has_pad:
            hit = jnp.logical_and(hit, valid)
        one_c = jnp.where(hit, 1.0, 0.0)
        inter_ref[c:c + 1, :] += jnp.sum(jnp.where(hit, soft_c, 0.0),
                                         axis=0, keepdims=True)
        denom_ref[c:c + 1, :] += jnp.sum(soft_c + one_c, axis=0, keepdims=True)
        x_t = x_t + jnp.where(hit, xs[c], 0.0)

    # weighted cross-entropy: (-x[target] + m + log s) * w  (w zero on padded columns)
    ce_pix = (m + log_s - x_t) * w                            # (TR, 128)
    ce_ref[...] += jnp.sum(ce_pix, axis=0, keepdims=True)     # (1, 128)


def _single_loss(x, target, weight, weight_dice, weight_ce, tile_rows=None):
    """Dice + weighted-CE combined loss for one logits tensor (N, C, H, W)."""
    N, C, H, W = x.shape
    HW = H * W
    P = N * HW

    # ---- layout: (N, C, H, W) -> (N, C, R, 128) dense per-channel slabs --------------
    HW128 = _round_up(HW, 128)
    R = HW128 // 128
    x3 = x.reshape(N, C, HW)
    t3 = target.reshape(N, 1, HW).astype(jnp.int32)
    w3 = weight.reshape(N, 1, HW)
    if HW128 != HW:      # pad only to the next 128 (needed for the reshape); rest masked
        pad = HW128 - HW
        x3 = jnp.pad(x3, ((0, 0), (0, 0), (0, pad)))
        t3 = jnp.pad(t3, ((0, 0), (0, 0), (0, pad)))
        w3 = jnp.pad(w3, ((0, 0), (0, 0), (0, pad)))
    x4 = x3.reshape(N, C, R, 128)
    t4 = t3.reshape(N, 1, R, 128)
    w4 = w3.reshape(N, 1, R, 128)

    # ---- tile-size selection (rows of 128 lanes), honest VMEM budget ------------------
    x_it = x4.dtype.itemsize
    w_it = w4.dtype.itemsize
    # double-buffered inputs + f32 in-kernel temporaries, per pixel
    bytes_per_pix = 2 * (C * x_it + 4 + w_it) + (2 * C + 10) * 4
    budget = 24 * 1024 * 1024
    cap_rows = (budget // bytes_per_pix) // 128
    cap_rows = max(8, min(512, (cap_rows // 8) * 8))
    if tile_rows is not None:
        cap_rows = max(8, (int(tile_rows) // 8) * 8)
    if R <= cap_rows:
        TR = R                                 # full extent (block dim == array dim)
    else:
        TR = cap_rows                          # multiple of 8 -> valid (8,128) tiling
        for cand in range(cap_rows, 7, -8):    # prefer a divisor of R (no ragged tile)
            if R % cand == 0:
                if cand >= cap_rows // 2:
                    TR = cand
                break
    num_tiles = -(-R // TR)

    # split the row-tile range across TensorCores when the batch axis can't (helps v7x)
    n_split = 2 if (N % 2 == 1 and num_tiles % 2 == 0 and num_tiles >= 2) else 1
    tiles_per_split = num_tiles // n_split
    has_pad = (n_split * tiles_per_split * TR * 128) != HW

    grid = (n_split, N, tiles_per_split)
    kern = functools.partial(_loss_kernel, hw_valid=HW,
                             tiles_per_split=tiles_per_split, has_pad=has_pad)

    est_vmem = TR * 128 * bytes_per_pix + (2 << 20)
    vmem_limit = int(min(48 << 20, max(24 << 20, est_vmem * 3 // 2)))

    def in_map(s, n, i):
        return (n, 0, s * tiles_per_split + i, 0)

    def out_map(s, n, i):
        return (s * N + n, 0, 0)

    inter, denom, ce = pl.pallas_call(
        kern,
        out_shape=(jax.ShapeDtypeStruct((n_split * N, C, 128), jnp.float32),
                   jax.ShapeDtypeStruct((n_split * N, C, 128), jnp.float32),
                   jax.ShapeDtypeStruct((n_split * N, 1, 128), jnp.float32)),
        grid=grid,
        in_specs=[pl.BlockSpec((None, C, TR, 128), in_map),
                  pl.BlockSpec((None, 1, TR, 128), in_map),
                  pl.BlockSpec((None, 1, TR, 128), in_map)],
        out_specs=(pl.BlockSpec((None, C, 128), out_map),
                   pl.BlockSpec((None, C, 128), out_map),
                   pl.BlockSpec((None, 1, 128), out_map)),
        compiler_params=pltpu.CompilerParams(
            dimension_semantics=("parallel", "parallel", "arbitrary"),
            vmem_limit_bytes=vmem_limit),
    )(x4, t4, w4)

    # ---- tiny scalar glue (O(N*C*128) elements) in plain JAX --------------------------
    eps = 0.001
    inter_c = jnp.sum(inter, axis=(0, 2))                     # (C,)
    denom_c = jnp.sum(denom, axis=(0, 2))                     # (C,)
    loss_per_channel = 1.0 - (2.0 * inter_c) / (denom_c + eps)
    dice_val = jnp.sum(loss_per_channel) / C                  # DiceLoss scalar; mean is identity
    ce_val = jnp.sum(ce) / P                                   # mean over N*H*W
    total_loss = weight_dice * dice_val + weight_ce * ce_val
    return total_loss, dice_val, ce_val


_single_loss_jit = jax.jit(_single_loss, static_argnums=(3, 4, 5))


def combined_loss_fuse_unet_v2_extended(inputxs, target, weight,
                                        weight_dice=1.0, weight_ce=1.0, tile_rows=None):
    """Mirrors the PyTorch forward: the loop over the deep-supervision heads overwrites
    the loss each iteration, so only the last head contributes to the returned values."""
    return _single_loss_jit(inputxs[-1], target, weight,
                            float(weight_dice), float(weight_ce), tile_rows)


def _reference(inputxs, target, weight, weight_dice=1.0, weight_ce=1.0):
    """Pure-JAX reference of the PyTorch semantics (for correctness check)."""
    for x in inputxs:
        N, C, H, W = x.shape
        soft = jax.nn.softmax(x.astype(jnp.float32), axis=1)
        onehot = jax.nn.one_hot(target, C, axis=1, dtype=jnp.float32)
        eps = 0.001
        num = 2.0 * jnp.sum(soft * onehot, axis=(0, 2, 3))
        den = jnp.sum(soft + onehot, axis=(0, 2, 3)) + eps
        dice_val = jnp.sum(1.0 - num / den) / C
        logsm = jax.nn.log_softmax(x.astype(jnp.float32), axis=1)
        ce_pix = -jnp.take_along_axis(logsm, target[:, None, :, :], axis=1)[:, 0]
        ce_val = jnp.mean(ce_pix * weight)
        total = weight_dice * dice_val + weight_ce * ce_val
    return total, dice_val, ce_val


def _check(inputxs, target, weight, tile_rows=None):
    total, dice, ce = combined_loss_fuse_unet_v2_extended(
        inputxs, target, weight, tile_rows=tile_rows)
    total, dice, ce = jax.block_until_ready((total, dice, ce))
    r_total, r_dice, r_ce = _reference(inputxs, target, weight)
    assert jnp.allclose(total, r_total, rtol=1e-4, atol=1e-5), (total, r_total)
    assert jnp.allclose(dice, r_dice, rtol=1e-4, atol=1e-5), (dice, r_dice)
    assert jnp.allclose(ce, r_ce, rtol=1e-4, atol=1e-5), (ce, r_ce)


if __name__ == "__main__":
    key = jax.random.PRNGKey(0)
    keys = jax.random.split(key, 10)

    # case 1: standard shapes (H*W a multiple of 128, single tile, two heads)
    N, C, H, W = 2, 4, 16, 16
    inputxs = [jax.random.normal(keys[0], (N, C, H, W), dtype=jnp.float32),
               jax.random.normal(keys[1], (N, C, H, W), dtype=jnp.float32)]
    target = jax.random.randint(keys[2], (N, H, W), 0, C, dtype=jnp.int32)
    weight = jax.random.uniform(keys[3], (N, H, W), dtype=jnp.float32)
    _check(inputxs, target, weight)

    # case 2: odd spatial size -> 128-pad + in-kernel valid mask
    N2, C2, H2, W2 = 1, 3, 9, 9
    inputxs2 = [jax.random.normal(keys[4], (N2, C2, H2, W2), dtype=jnp.float32)]
    target2 = jax.random.randint(keys[5], (N2, H2, W2), 0, C2, dtype=jnp.int32)
    weight2 = jax.random.uniform(keys[6], (N2, H2, W2), dtype=jnp.float32)
    _check(inputxs2, target2, weight2)

    # case 3: forced small tiles -> multi-tile accumulation, 2-way TensorCore split
    # (N=1, even tile count), ragged last tile handled by the valid mask
    N3, C3, H3, W3 = 1, 4, 56, 64
    inputxs3 = [jax.random.normal(keys[7], (N3, C3, H3, W3), dtype=jnp.float32)]
    target3 = jax.random.randint(keys[8], (N3, H3, W3), 0, C3, dtype=jnp.int32)
    weight3 = jax.random.uniform(keys[9], (N3, H3, W3), dtype=jnp.float32)
    _check(inputxs3, target3, weight3, tile_rows=8)

    print("KERNEL_OK")
</pallas_src>

<mosaic_0001>
module attributes {stable_mosaic.version = 11 : i64} {
  func.func @_loss_kernel(%arg0: i32, %arg1: i32, %arg2: i32, %arg3: memref<1x4x2x128xf32, #tpu.memory_space<vmem>>, %arg4: memref<1x1x2x128xi32, #tpu.memory_space<vmem>>, %arg5: memref<1x1x2x128xf32, #tpu.memory_space<vmem>>, %arg6: memref<1x4x128xf32, #tpu.memory_space<vmem>>, %arg7: memref<1x4x128xf32, #tpu.memory_space<vmem>>, %arg8: memref<1x1x128xf32, #tpu.memory_space<vmem>>) attributes {dimension_semantics = [#tpu.dimension_semantics<parallel>, #tpu.dimension_semantics<parallel>, #tpu.dimension_semantics<arbitrary>], iteration_bounds = array<i64: 1, 2, 1>, scalar_prefetch = 0 : i64, scratch_operands = 0 : i64, tpu.core_type = #tpu.core_type<tc>, window_params = [{transform_indices = @transform_0, window_bounds = array<i64: 1, 4, 2, 128>}, {transform_indices = @transform_1, window_bounds = array<i64: 1, 1, 2, 128>}, {transform_indices = @transform_2, window_bounds = array<i64: 1, 1, 2, 128>}, {transform_indices = @transform_3, window_bounds = array<i64: 1, 4, 128>}, {transform_indices = @transform_4, window_bounds = array<i64: 1, 4, 128>}, {transform_indices = @transform_5, window_bounds = array<i64: 1, 1, 128>}]} {
    %c0_i32 = arith.constant 0 : i32
    %0 = arith.cmpi eq, %arg2, %c0_i32 : i32
    %1 = arith.extui %0 : i1 to i32
    %c0_i32_0 = arith.constant 0 : i32
    %2 = arith.cmpi ne, %1, %c0_i32_0 : i32
    scf.if %2 {
      %cst_102 = arith.constant 0.000000e+00 : f32
      %159 = vector.broadcast %cst_102 : f32 to vector<4x128xf32>
      %c0_103 = arith.constant 0 : index
      %c0_104 = arith.constant 0 : index
      %c0_105 = arith.constant 0 : index
      %160 = vector.load %arg6[%c0_103, %c0_104, %c0_105] : memref<1x4x128xf32, #tpu.memory_space<vmem>>, vector<1x4x128xf32>
      %161 = vector.shape_cast %160 : vector<1x4x128xf32> to vector<4x128xf32>
      %162 = vector.shape_cast %159 : vector<4x128xf32> to vector<1x4x128xf32>
      tpu.vector_store %arg6[%c0_103, %c0_104, %c0_105], %162 {strides = array<i32>} : memref<1x4x128xf32, #tpu.memory_space<vmem>>, vector<1x4x128xf32>,
      %cst_106 = arith.constant 0.000000e+00 : f32
      %163 = vector.broadcast %cst_106 : f32 to vector<4x128xf32>
      %c0_107 = arith.constant 0 : index
      %c0_108 = arith.constant 0 : index
      %c0_109 = arith.constant 0 : index
      %164 = vector.load %arg7[%c0_107, %c0_108, %c0_109] : memref<1x4x128xf32, #tpu.memory_space<vmem>>, vector<1x4x128xf32>
      %165 = vector.shape_cast %164 : vector<1x4x128xf32> to vector<4x128xf32>
      %166 = vector.shape_cast %163 : vector<4x128xf32> to vector<1x4x128xf32>
      tpu.vector_store %arg7[%c0_107, %c0_108, %c0_109], %166 {strides = array<i32>} : memref<1x4x128xf32, #tpu.memory_space<vmem>>, vector<1x4x128xf32>,
      %cst_110 = arith.constant 0.000000e+00 : f32
      %167 = vector.broadcast %cst_110 : f32 to vector<1x128xf32>
      %c0_111 = arith.constant 0 : index
      %c0_112 = arith.constant 0 : index
      %c0_113 = arith.constant 0 : index
      %168 = vector.load %arg8[%c0_111, %c0_112, %c0_113] : memref<1x1x128xf32, #tpu.memory_space<vmem>>, vector<1x1x128xf32>
      %169 = vector.shape_cast %168 : vector<1x1x128xf32> to vector<1x128xf32>
      %170 = vector.shape_cast %167 : vector<1x128xf32> to vector<1x1x128xf32>
      tpu.vector_store %arg8[%c0_111, %c0_112, %c0_113], %170 {strides = array<i32>} : memref<1x1x128xf32, #tpu.memory_space<vmem>>, vector<1x1x128xf32>,
    } else {
    }
    %c0 = arith.constant 0 : index
    %c0_1 = arith.constant 0 : index
    %c0_2 = arith.constant 0 : index
    %c0_3 = arith.constant 0 : index
    %3 = vector.load %arg4[%c0, %c0_1, %c0_2, %c0_3] : memref<1x1x2x128xi32, #tpu.memory_space<vmem>>, vector<1x1x2x128xi32>
    %4 = vector.shape_cast %3 : vector<1x1x2x128xi32> to vector<2x128xi32>
    %c0_4 = arith.constant 0 : index
    %c0_5 = arith.constant 0 : index
    %c0_6 = arith.constant 0 : index
    %c0_7 = arith.constant 0 : index
    %5 = vector.load %arg5[%c0_4, %c0_5, %c0_6, %c0_7] : memref<1x1x2x128xf32, #tpu.memory_space<vmem>>, vector<1x1x2x128xf32>
    %6 = vector.shape_cast %5 : vector<1x1x2x128xf32> to vector<2x128xf32>
    %c0_8 = arith.constant 0 : index
    %c0_9 = arith.constant 0 : index
    %c0_10 = arith.constant 0 : index
    %c0_11 = arith.constant 0 : index
    %7 = vector.load %arg3[%c0_8, %c0_9, %c0_10, %c0_11] : memref<1x4x2x128xf32, #tpu.memory_space<vmem>>, vector<1x1x2x128xf32>
    %8 = vector.shape_cast %7 : vector<1x1x2x128xf32> to vector<2x128xf32>
    %c0_12 = arith.constant 0 : index
    %c1 = arith.constant 1 : index
    %c0_13 = arith.constant 0 : index
    %c0_14 = arith.constant 0 : index
    %9 = vector.load %arg3[%c0_12, %c1, %c0_13, %c0_14] : memref<1x4x2x128xf32, #tpu.memory_space<vmem>>, vector<1x1x2x128xf32>
    %10 = vector.shape_cast %9 : vector<1x1x2x128xf32> to vector<2x128xf32>
    %c0_15 = arith.constant 0 : index
    %c2 = arith.constant 2 : index
    %c0_16 = arith.constant 0 : index
    %c0_17 = arith.constant 0 : index
    %11 = vector.load %arg3[%c0_15, %c2, %c0_16, %c0_17] : memref<1x4x2x128xf32, #tpu.memory_space<vmem>>, vector<1x1x2x128xf32>
    %12 = vector.shape_cast %11 : vector<1x1x2x128xf32> to vector<2x128xf32>
    %c0_18 = arith.constant 0 : index
    %c3 = arith.constant 3 : index
    %c0_19 = arith.constant 0 : index
    %c0_20 = arith.constant 0 : index
    %13 = vector.load %arg3[%c0_18, %c3, %c0_19, %c0_20] : memref<1x4x2x128xf32, #tpu.memory_space<vmem>>, vector<1x1x2x128xf32>
    %14 = vector.shape_cast %13 : vector<1x1x2x128xf32> to vector<2x128xf32>
    %15 = arith.maximumf %8, %10 : vector<2x128xf32>
    %16 = arith.maximumf %15, %12 : vector<2x128xf32>
    %17 = arith.maximumf %16, %14 : vector<2x128xf32>
    %18 = arith.subf %8, %17 : vector<2x128xf32>
    %19 = math.exp %18 : vector<2x128xf32>
    %20 = arith.subf %10, %17 : vector<2x128xf32>
    %21 = math.exp %20 : vector<2x128xf32>
    %22 = arith.subf %12, %17 : vector<2x128xf32>
    %23 = math.exp %22 : vector<2x128xf32>
    %24 = arith.subf %14, %17 : vector<2x128xf32>
    %25 = math.exp %24 : vector<2x128xf32>
    %26 = arith.addf %19, %21 : vector<2x128xf32>
    %27 = arith.addf %26, %23 : vector<2x128xf32>
    %28 = arith.addf %27, %25 : vector<2x128xf32>
    %29 = tpu.reciprocal %28 {approx = true} : vector<2x128xf32> -> vector<2x128xf32>
    %30 = arith.mulf %28, %29 : vector<2x128xf32>
    %cst = arith.constant 2.000000e+00 : f32
    %31 = vector.broadcast %cst : f32 to vector<2x128xf32>
    %32 = arith.subf %31, %30 : vector<2x128xf32>
    %33 = arith.mulf %29, %32 : vector<2x128xf32>
    %34 = math.log %28 : vector<2x128xf32>
    %cst_21 = arith.constant 0.000000e+00 : f32
    %35 = vector.broadcast %cst_21 : f32 to vector<2x128xf32>
    %36 = arith.mulf %19, %33 : vector<2x128xf32>
    %c0_i32_22 = arith.constant 0 : i32
    %37 = vector.broadcast %c0_i32_22 : i32 to vector<2x128xi32>
    %38 = arith.cmpi eq, %4, %37 : vector<2x128xi32>
    %cst_23 = arith.constant 1.000000e+00 : f32
    %cst_24 = arith.constant 0.000000e+00 : f32
    %39 = vector.broadcast %cst_23 : f32 to vector<2x128xf32>
    %40 = vector.broadcast %cst_24 : f32 to vector<2x128xf32>
    %41 = arith.select %38, %39, %40 : vector<2x128xi1>, vector<2x128xf32>
    %c0_25 = arith.constant 0 : index
    %c0_26 = arith.constant 0 : index
    %c0_27 = arith.constant 0 : index
    %42 = vector.load %arg6[%c0_25, %c0_26, %c0_27] : memref<1x4x128xf32, #tpu.memory_space<vmem>>, vector<1x1x128xf32>
    %43 = vector.shape_cast %42 : vector<1x1x128xf32> to vector<1x128xf32>
    %cst_28 = arith.constant 0.000000e+00 : f32
    %44 = vector.broadcast %cst_28 : f32 to vector<2x128xf32>
    %45 = arith.select %38, %36, %44 : vector<2x128xi1>, vector<2x128xf32>
    %cst_29 = arith.constant dense<0.000000e+00> : vector<128xf32>
    %46 = vector.multi_reduction <add>, %45, %cst_29 [0] : vector<2x128xf32> to vector<128xf32>
    %47 = vector.shape_cast %46 : vector<128xf32> to vector<1x128xf32>
    %48 = arith.addf %43, %47 : vector<1x128xf32>
    %c0_30 = arith.constant 0 : index
    %c0_31 = arith.constant 0 : index
    %c0_32 = arith.constant 0 : index
    %49 = vector.load %arg6[%c0_30, %c0_31, %c0_32] : memref<1x4x128xf32, #tpu.memory_space<vmem>>, vector<1x1x128xf32>
    %50 = vector.shape_cast %49 : vector<1x1x128xf32> to vector<1x128xf32>
    %51 = vector.shape_cast %48 : vector<1x128xf32> to vector<1x1x128xf32>
    tpu.vector_store %arg6[%c0_30, %c0_31, %c0_32], %51 {strides = array<i32>} : memref<1x4x128xf32, #tpu.memory_space<vmem>>, vector<1x1x128xf32>,
    %c0_33 = arith.constant 0 : index
    %c0_34 = arith.constant 0 : index
    %c0_35 = arith.constant 0 : index
    %52 = vector.load %arg7[%c0_33, %c0_34, %c0_35] : memref<1x4x128xf32, #tpu.memory_space<vmem>>, vector<1x1x128xf32>
    %53 = vector.shape_cast %52 : vector<1x1x128xf32> to vector<1x128xf32>
    %54 = arith.addf %36, %41 : vector<2x128xf32>
    %cst_36 = arith.constant dense<0.000000e+00> : vector<128xf32>
    %55 = vector.multi_reduction <add>, %54, %cst_36 [0] : vector<2x128xf32> to vector<128xf32>
    %56 = vector.shape_cast %55 : vector<128xf32> to vector<1x128xf32>
    %57 = arith.addf %53, %56 : vector<1x128xf32>
    %c0_37 = arith.constant 0 : index
    %c0_38 = arith.constant 0 : index
    %c0_39 = arith.constant 0 : index
    %58 = vector.load %arg7[%c0_37, %c0_38, %c0_39] : memref<1x4x128xf32, #tpu.memory_space<vmem>>, vector<1x1x128xf32>
    %59 = vector.shape_cast %58 : vector<1x1x128xf32> to vector<1x128xf32>
    %60 = vector.shape_cast %57 : vector<1x128xf32> to vector<1x1x128xf32>
    tpu.vector_store %arg7[%c0_37, %c0_38, %c0_39], %60 {strides = array<i32>} : memref<1x4x128xf32, #tpu.memory_space<vmem>>, vector<1x1x128xf32>,
    %cst_40 = arith.constant 0.000000e+00 : f32
    %61 = vector.broadcast %cst_40 : f32 to vector<2x128xf32>
    %62 = arith.select %38, %8, %61 : vector<2x128xi1>, vector<2x128xf32>
    %63 = arith.addf %35, %62 : vector<2x128xf32>
    %64 = arith.mulf %21, %33 : vector<2x128xf32>
    %c1_i32 = arith.constant 1 : i32
    %65 = vector.broadcast %c1_i32 : i32 to vector<2x128xi32>
    %66 = arith.cmpi eq, %4, %65 : vector<2x128xi32>
    %cst_41 = arith.constant 1.000000e+00 : f32
    %cst_42 = arith.constant 0.000000e+00 : f32
    %67 = vector.broadcast %cst_41 : f32 to vector<2x128xf32>
    %68 = vector.broadcast %cst_42 : f32 to vector<2x128xf32>
    %69 = arith.select %66, %67, %68 : vector<2x128xi1>, vector<2x128xf32>
    %c0_43 = arith.constant 0 : index
    %c1_44 = arith.constant 1 : index
    %c0_45 = arith.constant 0 : index
    %70 = vector.load %arg6[%c0_43, %c1_44, %c0_45] : memref<1x4x128xf32, #tpu.memory_space<vmem>>, vector<1x1x128xf32>
    %71 = vector.shape_cast %70 : vector<1x1x128xf32> to vector<1x128xf32>
    %cst_46 = arith.constant 0.000000e+00 : f32
    %72 = vector.broadcast %cst_46 : f32 to vector<2x128xf32>
    %73 = arith.select %66, %64, %72 : vector<2x128xi1>, vector<2x128xf32>
    %cst_47 = arith.constant dense<0.000000e+00> : vector<128xf32>
    %74 = vector.multi_reduction <add>, %73, %cst_47 [0] : vector<2x128xf32> to vector<128xf32>
    %75 = vector.shape_cast %74 : vector<128xf32> to vector<1x128xf32>
    %76 = arith.addf %71, %75 : vector<1x128xf32>
    %c0_48 = arith.constant 0 : index
    %c1_49 = arith.constant 1 : index
    %c0_50 = arith.constant 0 : index
    %77 = vector.load %arg6[%c0_48, %c1_49, %c0_50] : memref<1x4x128xf32, #tpu.memory_space<vmem>>, vector<1x1x128xf32>
    %78 = vector.shape_cast %77 : vector<1x1x128xf32> to vector<1x128xf32>
    %79 = vector.shape_cast %76 : vector<1x128xf32> to vector<1x1x128xf32>
    tpu.vector_store %arg6[%c0_48, %c1_49, %c0_50], %79 {strides = array<i32>} : memref<1x4x128xf32, #tpu.memory_space<vmem>>, vector<1x1x128xf32>,
    %c0_51 = arith.constant 0 : index
    %c1_52 = arith.constant 1 : index
    %c0_53 = arith.constant 0 : index
    %80 = vector.load %arg7[%c0_51, %c1_52, %c0_53] : memref<1x4x128xf32, #tpu.memory_space<vmem>>, vector<1x1x128xf32>
    %81 = vector.shape_cast %80 : vector<1x1x128xf32> to vector<1x128xf32>
    %82 = arith.addf %64, %69 : vector<2x128xf32>
    %cst_54 = arith.constant dense<0.000000e+00> : vector<128xf32>
    %83 = vector.multi_reduction <add>, %82, %cst_54 [0] : vector<2x128xf32> to vector<128xf32>
    %84 = vector.shape_cast %83 : vector<128xf32> to vector<1x128xf32>
    %85 = arith.addf %81, %84 : vector<1x128xf32>
    %c0_55 = arith.constant 0 : index
    %c1_56 = arith.constant 1 : index
    %c0_57 = arith.constant 0 : index
    %86 = vector.load %arg7[%c0_55, %c1_56, %c0_57] : memref<1x4x128xf32, #tpu.memory_space<vmem>>, vector<1x1x128xf32>
    %87 = vector.shape_cast %86 : vector<1x1x128xf32> to vector<1x128xf32>
    %88 = vector.shape_cast %85 : vector<1x128xf32> to vector<1x1x128xf32>
    tpu.vector_store %arg7[%c0_55, %c1_56, %c0_57], %88 {strides = array<i32>} : memref<1x4x128xf32, #tpu.memory_space<vmem>>, vector<1x1x128xf32>,
    %cst_58 = arith.constant 0.000000e+00 : f32
    %89 = vector.broadcast %cst_58 : f32 to vector<2x128xf32>
    %90 = arith.select %66, %10, %89 : vector<2x128xi1>, vector<2x128xf32>
    %91 = arith.addf %63, %90 : vector<2x128xf32>
    %92 = arith.mulf %23, %33 : vector<2x128xf32>
    %c2_i32 = arith.constant 2 : i32
    %93 = vector.broadcast %c2_i32 : i32 to vector<2x128xi32>
    %94 = arith.cmpi eq, %4, %93 : vector<2x128xi32>
    %cst_59 = arith.constant 1.000000e+00 : f32
    %cst_60 = arith.constant 0.000000e+00 : f32
    %95 = vector.broadcast %cst_59 : f32 to vector<2x128xf32>
    %96 = vector.broadcast %cst_60 : f32 to vector<2x128xf32>
    %97 = arith.select %94, %95, %96 : vector<2x128xi1>, vector<2x128xf32>
    %c0_61 = arith.constant 0 : index
    %c2_62 = arith.constant 2 : index
    %c0_63 = arith.constant 0 : index
    %98 = vector.load %arg6[%c0_61, %c2_62, %c0_63] : memref<1x4x128xf32, #tpu.memory_space<vmem>>, vector<1x1x128xf32>
    %99 = vector.shape_cast %98 : vector<1x1x128xf32> to vector<1x128xf32>
    %cst_64 = arith.constant 0.000000e+00 : f32
    %100 = vector.broadcast %cst_64 : f32 to vector<2x128xf32>
    %101 = arith.select %94, %92, %100 : vector<2x128xi1>, vector<2x128xf32>
    %cst_65 = arith.constant dense<0.000000e+00> : vector<128xf32>
    %102 = vector.multi_reduction <add>, %101, %cst_65 [0] : vector<2x128xf32> to vector<128xf32>
    %103 = vector.shape_cast %102 : vector<128xf32> to vector<1x128xf32>
    %104 = arith.addf %99, %103 : vector<1x128xf32>
    %c0_66 = arith.constant 0 : index
    %c2_67 = arith.constant 2 : index
    %c0_68 = arith.constant 0 : index
    %105 = vector.load %arg6[%c0_66, %c2_67, %c0_68] : memref<1x4x128xf32, #tpu.memory_space<vmem>>, vector<1x1x128xf32>
    %106 = vector.shape_cast %105 : vector<1x1x128xf32> to vector<1x128xf32>
    %107 = vector.shape_cast %104 : vector<1x128xf32> to vector<1x1x128xf32>
    tpu.vector_store %arg6[%c0_66, %c2_67, %c0_68], %107 {strides = array<i32>} : memref<1x4x128xf32, #tpu.memory_space<vmem>>, vector<1x1x128xf32>,
    %c0_69 = arith.constant 0 : index
    %c2_70 = arith.constant 2 : index
    %c0_71 = arith.constant 0 : index
    %108 = vector.load %arg7[%c0_69, %c2_70, %c0_71] : memref<1x4x128xf32, #tpu.memory_space<vmem>>, vector<1x1x128xf32>
    %109 = vector.shape_cast %108 : vector<1x1x128xf32> to vector<1x128xf32>
    %110 = arith.addf %92, %97 : vector<2x128xf32>
    %cst_72 = arith.constant dense<0.000000e+00> : vector<128xf32>
    %111 = vector.multi_reduction <add>, %110, %cst_72 [0] : vector<2x128xf32> to vector<128xf32>
    %112 = vector.shape_cast %111 : vector<128xf32> to vector<1x128xf32>
    %113 = arith.addf %109, %112 : vector<1x128xf32>
    %c0_73 = arith.constant 0 : index
    %c2_74 = arith.constant 2 : index
    %c0_75 = arith.constant 0 : index
    %114 = vector.load %arg7[%c0_73, %c2_74, %c0_75] : memref<1x4x128xf32, #tpu.memory_space<vmem>>, vector<1x1x128xf32>
    %115 = vector.shape_cast %114 : vector<1x1x128xf32> to vector<1x128xf32>
    %116 = vector.shape_cast %113 : vector<1x128xf32> to vector<1x1x128xf32>
    tpu.vector_store %arg7[%c0_73, %c2_74, %c0_75], %116 {strides = array<i32>} : memref<1x4x128xf32, #tpu.memory_space<vmem>>, vector<1x1x128xf32>,
    %cst_76 = arith.constant 0.000000e+00 : f32
    %117 = vector.broadcast %cst_76 : f32 to vector<2x128xf32>
    %118 = arith.select %94, %12, %117 : vector<2x128xi1>, vector<2x128xf32>
    %119 = arith.addf %91, %118 : vector<2x128xf32>
    %120 = arith.mulf %25, %33 : vector<2x128xf32>
    %c3_i32 = arith.constant 3 : i32
    %121 = vector.broadcast %c3_i32 : i32 to vector<2x128xi32>
    %122 = arith.cmpi eq, %4, %121 : vector<2x128xi32>
    %cst_77 = arith.constant 1.000000e+00 : f32
    %cst_78 = arith.constant 0.000000e+00 : f32
    %123 = vector.broadcast %cst_77 : f32 to vector<2x128xf32>
    %124 = vector.broadcast %cst_78 : f32 to vector<2x128xf32>
    %125 = arith.select %122, %123, %124 : vector<2x128xi1>, vector<2x128xf32>
    %c0_79 = arith.constant 0 : index
    %c3_80 = arith.constant 3 : index
    %c0_81 = arith.constant 0 : index
    %126 = vector.load %arg6[%c0_79, %c3_80, %c0_81] : memref<1x4x128xf32, #tpu.memory_space<vmem>>, vector<1x1x128xf32>
    %127 = vector.shape_cast %126 : vector<1x1x128xf32> to vector<1x128xf32>
    %cst_82 = arith.constant 0.000000e+00 : f32
    %128 = vector.broadcast %cst_82 : f32 to vector<2x128xf32>
    %129 = arith.select %122, %120, %128 : vector<2x128xi1>, vector<2x128xf32>
    %cst_83 = arith.constant dense<0.000000e+00> : vector<128xf32>
    %130 = vector.multi_reduction <add>, %129, %cst_83 [0] : vector<2x128xf32> to vector<128xf32>
    %131 = vector.shape_cast %130 : vector<128xf32> to vector<1x128xf32>
    %132 = arith.addf %127, %131 : vector<1x128xf32>
    %c0_84 = arith.constant 0 : index
    %c3_85 = arith.constant 3 : index
    %c0_86 = arith.constant 0 : index
    %133 = vector.load %arg6[%c0_84, %c3_85, %c0_86] : memref<1x4x128xf32, #tpu.memory_space<vmem>>, vector<1x1x128xf32>
    %134 = vector.shape_cast %133 : vector<1x1x128xf32> to vector<1x128xf32>
    %135 = vector.shape_cast %132 : vector<1x128xf32> to vector<1x1x128xf32>
    tpu.vector_store %arg6[%c0_84, %c3_85, %c0_86], %135 {strides = array<i32>} : memref<1x4x128xf32, #tpu.memory_space<vmem>>, vector<1x1x128xf32>,
    %c0_87 = arith.constant 0 : index
    %c3_88 = arith.constant 3 : index
    %c0_89 = arith.constant 0 : index
    %136 = vector.load %arg7[%c0_87, %c3_88, %c0_89] : memref<1x4x128xf32, #tpu.memory_space<vmem>>, vector<1x1x128xf32>
    %137 = vector.shape_cast %136 : vector<1x1x128xf32> to vector<1x128xf32>
    %138 = arith.addf %120, %125 : vector<2x128xf32>
    %cst_90 = arith.constant dense<0.000000e+00> : vector<128xf32>
    %139 = vector.multi_reduction <add>, %138, %cst_90 [0] : vector<2x128xf32> to vector<128xf32>
    %140 = vector.shape_cast %139 : vector<128xf32> to vector<1x128xf32>
    %141 = arith.addf %137, %140 : vector<1x128xf32>
    %c0_91 = arith.constant 0 : index
    %c3_92 = arith.constant 3 : index
    %c0_93 = arith.constant 0 : index
    %142 = vector.load %arg7[%c0_91, %c3_92, %c0_93] : memref<1x4x128xf32, #tpu.memory_space<vmem>>, vector<1x1x128xf32>
    %143 = vector.shape_cast %142 : vector<1x1x128xf32> to vector<1x128xf32>
    %144 = vector.shape_cast %141 : vector<1x128xf32> to vector<1x1x128xf32>
    tpu.vector_store %arg7[%c0_91, %c3_92, %c0_93], %144 {strides = array<i32>} : memref<1x4x128xf32, #tpu.memory_space<vmem>>, vector<1x1x128xf32>,
    %cst_94 = arith.constant 0.000000e+00 : f32
    %145 = vector.broadcast %cst_94 : f32 to vector<2x128xf32>
    %146 = arith.select %122, %14, %145 : vector<2x128xi1>, vector<2x128xf32>
    %147 = arith.addf %119, %146 : vector<2x128xf32>
    %148 = arith.addf %17, %34 : vector<2x128xf32>
    %149 = arith.subf %148, %147 : vector<2x128xf32>
    %150 = arith.mulf %149, %6 : vector<2x128xf32>
    %c0_95 = arith.constant 0 : index
    %c0_96 = arith.constant 0 : index
    %c0_97 = arith.constant 0 : index
    %151 = vector.load %arg8[%c0_95, %c0_96, %c0_97] : memref<1x1x128xf32, #tpu.memory_space<vmem>>, vector<1x1x128xf32>
    %152 = vector.shape_cast %151 : vector<1x1x128xf32> to vector<1x128xf32>
    %cst_98 = arith.constant dense<0.000000e+00> : vector<128xf32>
    %153 = vector.multi_reduction <add>, %150, %cst_98 [0] : vector<2x128xf32> to vector<128xf32>
    %154 = vector.shape_cast %153 : vector<128xf32> to vector<1x128xf32>
    %155 = arith.addf %152, %154 : vector<1x128xf32>
    %c0_99 = arith.constant 0 : index
    %c0_100 = arith.constant 0 : index
    %c0_101 = arith.constant 0 : index
    %156 = vector.load %arg8[%c0_99, %c0_100, %c0_101] : memref<1x1x128xf32, #tpu.memory_space<vmem>>, vector<1x1x128xf32>
    %157 = vector.shape_cast %156 : vector<1x1x128xf32> to vector<1x128xf32>
    %158 = vector.shape_cast %155 : vector<1x128xf32> to vector<1x1x128xf32>
    tpu.vector_store %arg8[%c0_99, %c0_100, %c0_101], %158 {strides = array<i32>} : memref<1x1x128xf32, #tpu.memory_space<vmem>>, vector<1x1x128xf32>,
    return
  }
  func.func @transform_0(%arg0: i32, %arg1: i32, %arg2: i32) -> (i32, i32, i32, i32) {
    %c1_i32 = arith.constant 1 : i32
    %0 = arith.muli %arg0, %c1_i32 : i32
    %1 = arith.addi %0, %arg2 : i32
    %c0_i32 = arith.constant 0 : i32
    %c0_i32_0 = arith.constant 0 : i32
    %c0_i32_1 = arith.constant 0 : i32
    return %arg1, %c0_i32, %1, %c0_i32_0 : i32, i32, i32, i32
  }
  func.func @transform_1(%arg0: i32, %arg1: i32, %arg2: i32) -> (i32, i32, i32, i32) {
    %c1_i32 = arith.constant 1 : i32
    %0 = arith.muli %arg0, %c1_i32 : i32
    %1 = arith.addi %0, %arg2 : i32
    %c0_i32 = arith.constant 0 : i32
    %c0_i32_0 = arith.constant 0 : i32
    %c0_i32_1 = arith.constant 0 : i32
    return %arg1, %c0_i32, %1, %c0_i32_0 : i32, i32, i32, i32
  }
  func.func @transform_2(%arg0: i32, %arg1: i32, %arg2: i32) -> (i32, i32, i32, i32) {
    %c1_i32 = arith.constant 1 : i32
    %0 = arith.muli %arg0, %c1_i32 : i32
    %1 = arith.addi %0, %arg2 : i32
    %c0_i32 = arith.constant 0 : i32
    %c0_i32_0 = arith.constant 0 : i32
    %c0_i32_1 = arith.constant 0 : i32
    return %arg1, %c0_i32, %1, %c0_i32_0 : i32, i32, i32, i32
  }
  func.func @transform_3(%arg0: i32, %arg1: i32, %arg2: i32) -> (i32, i32, i32) {
    %c2_i32 = arith.constant 2 : i32
    %0 = arith.muli %arg0, %c2_i32 : i32
    %1 = arith.addi %0, %arg1 : i32
    %c0_i32 = arith.constant 0 : i32
    %c0_i32_0 = arith.constant 0 : i32
    %c0_i32_1 = arith.constant 0 : i32
    return %1, %c0_i32, %c0_i32_0 : i32, i32, i32
  }
  func.func @transform_4(%arg0: i32, %arg1: i32, %arg2: i32) -> (i32, i32, i32) {
    %c2_i32 = arith.constant 2 : i32
    %0 = arith.muli %arg0, %c2_i32 : i32
    %1 = arith.addi %0, %arg1 : i32
    %c0_i32 = arith.constant 0 : i32
    %c0_i32_0 = arith.constant 0 : i32
    %c0_i32_1 = arith.constant 0 : i32
    return %1, %c0_i32, %c0_i32_0 : i32, i32, i32
  }
  func.func @transform_5(%arg0: i32, %arg1: i32, %arg2: i32) -> (i32, i32, i32) {
    %c2_i32 = arith.constant 2 : i32
    %0 = arith.muli %arg0, %c2_i32 : i32
    %1 = arith.addi %0, %arg1 : i32
    %c0_i32 = arith.constant 0 : i32
    %c0_i32_0 = arith.constant 0 : i32
    %c0_i32_1 = arith.constant 0 : i32
    return %1, %c0_i32, %c0_i32_0 : i32, i32, i32
  }
}

</mosaic_0001>

<bundles_post_ra>
// kernel: _single_loss.1
= control target key start
LH: loop header
LB: loop body
LE: loop exit
PB: predicated region body
PF: predicated region fallthrough
CT: control target
= control target key end

     0   :  { %s825_s18 = smov 0   ;;  %s827_s19 = smov 0   ;;  %s956_s0 = inlined_call_operand.vmem [shape: f32[2,4,2,128], index: 0, kind: input, shape index: {}]   ;;  %s957_s1 = inlined_call_operand.vmem [shape: s32[2,1,2,128], index: 1, kind: input, shape index: {}]   ;;  %s958_s2 = inlined_call_operand.vmem [shape: f32[2,1,2,128], index: 2, kind: input, shape index: {}]   ;;  %s959_s3 = inlined_call_operand.vmem [shape: f32[2,4,128], index: 3, kind: output, shape index: {0}]   ;;  %s960_s4 = inlined_call_operand.vmem [shape: f32[2,4,128], index: 4, kind: output, shape index: {1}]   ;;  %s961_s5 = inlined_call_operand.vmem [shape: f32[2,1,128], index: 5, kind: output, shape index: {2}]  }
   0x1   :  { %s829_s20 = smov 0  }
   0x2 LB: > { %s31_s21 = sadd.s32 1, %s788_s19  ;;  %p720_p0 = scmp.ge.s32.totalorder %s792_s20, 1  ;;  %s792_s20 = sphi %s829_s20, %s16_s20   ;;  %s788_s19 = sphi %s827_s19, %s963_s19   ;;  %s784_s18 = sphi %s825_s18, %s962_s18  }
   0x3   : > { %p33_p1 = scmp.ge.s32.totalorder %s31_s21, 2  ;;  %p268_p2 = scmp.lt.s32.totalorder %s792_s20, 3 }
   0x5   : > { %s965_s21 = smov (%p33_p1, %s31_s21), 0  ;;  %p269_p3 = pnand %p720_p0, %p268_p2 }
   0x6   : > { %p329_p4 = scmp.lt.s32.totalorder (!%p269_p3), %s784_s18, 1 }
   0x7   : > { %272 = sbr.rel (%p269_p3) target bundleno = 89 (0x59), region = 32 }
   0xc   : > { %s967_s18 = smov (!%p329_p4, %s784_s18), 1  ;;  %v794_v0 = vmov 0.0   ;;  %vm424_vm4 = vcmask 1041408  }
   0xd   : > { %s725_s22 = sshll.u32 %s967_s18, 2  ;;  %s850_s25 = scalar_lea.vmem %s961_s5, %s967_s18 }
   0xe   : > { %s855_s28 = scalar_lea.vmem %s959_s3, %s725_s22  ;;  %s860_s6 = scalar_lea.vmem %s960_s4, %s725_s22  ;;  %385 = vst [vmem:[%s850_s25] sm:$0x1] %v794_v0 }
   0xf   : > { %383 = vst [vmem:[%s855_s28] sm:$0xf] %v794_v0  ;;  %s732_s7 = sshll.u32 %s967_s18, 3  ;;  %s723_s11 = sshll.u32 %s967_s18, 1 }
  0x10   : > { %384 = vst [vmem:[%s860_s6] sm:$0xf] %v794_v0  ;;  %s336_s10 = scalar_lea.vmem %s956_s0, %s732_s7  ;;  %s345_s14 = scalar_lea.vmem %s957_s1, %s723_s11 }
  0x11   : > { %v388_v1 = vld [vmem:[%s336_s10] sm:$0x3]  ;;  %v727_v2 = vld [vmem:[%s336_s10 + $0x2] sm:$0x3]  ;;  %v728_v3 = vld [vmem:[%s336_s10 + $0x4] sm:$0x3]  ;;  %s354_s17 = scalar_lea.vmem %s958_s2, %s723_s11 }
  0x12   : > { %v395_v4 = vmax.f32 %v388_v1, %v727_v2  ;;  %v729_v5 = vld [vmem:[%s336_s10 + $0x6] sm:$0x3]  ;;  %v878_v16 = vld [vmem:[%s345_s14] sm:$0x3] }
  0x13   : > { %vm420_vm0 = vcmp.eq.s32.totalorder %v878_v16, 0  ;;  %vm448_vm1 = vcmp.eq.s32.totalorder %v878_v16, 1  ;;  %vm475_vm2 = vcmp.eq.s32.totalorder %v878_v16, 2  ;;  %vm502_vm3 = vcmp.eq.s32.totalorder %v878_v16, 3  ;;  %v387_v38 = vld [vmem:[%s354_s17] sm:$0x3] }
  0x14   : > { %v396_v6 = vmax.f32 %v395_v4, %v728_v3  ;;  %v445_v23 = vsel %vm420_vm0, %v388_v1, 0.0  ;;  %v472_v24 = vsel %vm448_vm1, %v727_v2, 0.0  ;;  %v499_v27 = vsel %vm475_vm2, %v728_v3, 0.0 }
  0x15   : > { %v473_v26 = vadd.f32 %v472_v24, %v445_v23  ;;  %v526_v29 = vsel %vm502_vm3, %v729_v5, 0.0  ;;  %v421_v39 = vsel %vm420_vm0, 1.0, %v794_v0  ;;  %v449_v40 = vsel %vm448_vm1, 1.0, %v794_v0 }
  0x16   : > { %v397_v7 = vmax.f32 %v396_v6, %v729_v5  ;;  %v476_v45 = vsel %vm475_vm2, 1.0, %v794_v0  ;;  %v503_v47 = vsel %vm502_vm3, 1.0, %v794_v0 }
  0x17   : > { %v500_v28 = vadd.f32 %v499_v27, %v473_v26 }
  0x18   : > { %v398_v8 = vsub.f32 %v388_v1, %v397_v7  ;;  %v401_v9 = vsub.f32 %v727_v2, %v397_v7  ;;  %v404_v10 = vsub.f32 %v728_v3, %v397_v7  ;;  %v407_v11 = vsub.f32 %v729_v5, %v397_v7 }
  0x19   : > { %v527_v34 = vadd.f32 %v526_v29, %v500_v28  ;;  %v422_v29 = vld [vmem:[%s855_s28] sm:$0x1] }
  0x1a   : > { %v399_v12 = vmul.f32 1.442695, %v398_v8  ;;  %v402_v13 = vmul.f32 1.442695, %v401_v9  ;;  %v405_v14 = vmul.f32 1.442695, %v404_v10 }
  0x1b   : > { %v408_v15 = vmul.f32 1.442695, %v407_v11 }
  0x1c   : > { %758 = vpow2.f32 %v399_v12 }
  0x1d   : > { %760 = vpow2.f32 %v402_v13 }
  0x1e   : > { %762 = vpow2.f32 %v405_v14 }
  0x1f   : > { %764 = vpow2.f32 %v408_v15 }
  0x22   : > { %v759_v17 = vpop.eup %758 }
  0x23   : > { %v761_v18 = vpop.eup %760 }
  0x24   : > { %v763_v19 = vpop.eup %762  ;;  %v410_v20 = vadd.f32 %v761_v18, %v759_v17 }
  0x25   : > { %v765_v21 = vpop.eup %764 }
  0x26   : > { %v411_v22 = vadd.f32 %v763_v19, %v410_v20 }
  0x28   : > { %v412_v25 = vadd.f32 %v765_v21, %v411_v22 }
  0x2a   : > { %766 = vrcp.f32 %v412_v25 }
  0x2b   : > { %768 = vlog2.f32 %v412_v25 }
  0x30   : > { %v767_v30 = vpop.eup %766 }
  0x31   : > { %v769_v31 = vpop.eup %768  ;;  %v414_v32 = vmul.f32 %v767_v30, %v412_v25 }
  0x32   : > { %v418_v33 = vmul.f32 0.6931472, %v769_v31  ;;  %v450_v31 = vld [vmem:[%s855_s28 + $0x1] sm:$0x1] }
  0x33   : > { %v415_v35 = vsub.f32 2.0, %v414_v32 }
  0x34   : > { %v528_v36 = vadd.f32 %v418_v33, %v397_v7 }
  0x35   : > { %v416_v37 = vmul.f32 %v767_v30, %v415_v35 }
  0x36   : > { %v529_v41 = vsub.f32 %v528_v36, %v527_v34  ;;  %v434_v36 = vld [vmem:[%s860_s6] sm:$0x1] }
  0x37   : > { %v419_v42 = vmul.f32 %v759_v17, %v416_v37  ;;  %v447_v43 = vmul.f32 %v761_v18, %v416_v37  ;;  %v474_v44 = vmul.f32 %v763_v19, %v416_v37  ;;  %v501_v46 = vmul.f32 %v765_v21, %v416_v37 }
  0x38   : > { %v909_v48 = vmul.f32 %v529_v41, %v387_v38  ;;  %v461_v38 = vld [vmem:[%s860_s6 + $0x1] sm:$0x1] }
  0x39   : > { %v423_v49 = vsel %vm420_vm0, %v419_v42, 0.0  ;;  %v435_v50 = vadd.f32 %v421_v39, %v419_v42  ;;  %v451_v51 = vsel %vm448_vm1, %v447_v43, 0.0  ;;  %v462_v52 = vadd.f32 %v449_v40, %v447_v43  ;;  %v477_v43 = vld [vmem:[%s855_s28 + $0x2] sm:$0x1] }
  0x3a   : > { %v425_v53 = vsel %vm424_vm4, %v423_v49, 0.0  ;;  %v452_v54 = vsel %vm424_vm4, %v451_v51, 0.0  ;;  %v478_v55 = vsel %vm475_vm2, %v474_v44, 0.0  ;;  %v489_v56 = vadd.f32 %v476_v45, %v474_v44 }
  0x3b   : > { %v426_v57 = vrot.slane %v425_v53, 4  ;;  %v436_v58 = vsel %vm424_vm4, %v435_v50, 0.0  ;;  %v453_v59 = vrot.slane %v452_v54, 4  ;;  %v463_v60 = vsel %vm424_vm4, %v462_v52, 0.0  ;;  %v488_v50 = vld [vmem:[%s860_s6 + $0x2] sm:$0x1] }
  0x3c   : > { %v437_v61 = vrot.slane %v436_v58, 4  ;;  %v464_v62 = vrot.slane %v463_v60, 4  ;;  %v479_v63 = vsel %vm424_vm4, %v478_v55, 0.0  ;;  %v490_v0 = vsel %vm424_vm4, %v489_v56, 0.0 }
  0x3d   : > { %v427_v1 = vadd.f32 %v426_v57, %v425_v53  ;;  %v454_v2 = vadd.f32 %v453_v59, %v452_v54  ;;  %v480_v3 = vrot.slane %v479_v63, 4  ;;  %v491_v4 = vrot.slane %v490_v0, 4 }
  0x3e   : > { %v438_v5 = vadd.f32 %v437_v61, %v436_v58  ;;  %v465_v6 = vadd.f32 %v464_v62, %v463_v60  ;;  %v505_v7 = vsel %vm502_vm3, %v501_v46, 0.0  ;;  %v516_v8 = vadd.f32 %v503_v47, %v501_v46  ;;  %v504_v62 = vld [vmem:[%s855_s28 + $0x3] sm:$0x1] }
  0x3f   : > { %v428_v9 = vrot.slane %v427_v1, 2  ;;  %v455_v10 = vrot.slane %v454_v2, 2  ;;  %v481_v11 = vadd.f32 %v480_v3, %v479_v63  ;;  %v492_v12 = vadd.f32 %v491_v4, %v490_v0  ;;  %v515_v63 = vld [vmem:[%s860_s6 + $0x3] sm:$0x1] }
  0x40   : > { %v439_v13 = vrot.slane %v438_v5, 2  ;;  %v466_v14 = vrot.slane %v465_v6, 2  ;;  %v506_v15 = vsel %vm424_vm4, %v505_v7, 0.0  ;;  %v517_v17 = vsel %vm424_vm4, %v516_v8, 0.0  ;;  %v531_v7 = vld [vmem:[%s850_s25] sm:$0x1] }
  0x41   : > { %v429_v18 = vadd.f32 %v428_v9, %v427_v1  ;;  %v456_v19 = vadd.f32 %v455_v10, %v454_v2  ;;  %v482_v20 = vrot.slane %v481_v11, 2  ;;  %v493_v21 = vrot.slane %v492_v12, 2 }
  0x42   : > { %v440_v16 = vadd.f32 %v439_v13, %v438_v5  ;;  %v467_v22 = vadd.f32 %v466_v14, %v465_v6  ;;  %v507_v23 = vrot.slane %v506_v15, 4  ;;  %v518_v24 = vrot.slane %v517_v17, 4 }
  0x43   : > { %v430_v25 = vrot.slane %v429_v18, 1  ;;  %v457_v26 = vrot.slane %v456_v19, 1  ;;  %v483_v27 = vadd.f32 %v482_v20, %v481_v11  ;;  %v494_v28 = vadd.f32 %v493_v21, %v492_v12 }
  0x44   : > { %v441_v30 = vrot.slane %v440_v16, 1  ;;  %v468_v32 = vrot.slane %v467_v22, 1  ;;  %v508_v33 = vadd.f32 %v507_v23, %v506_v15  ;;  %v519_v34 = vadd.f32 %v518_v24, %v517_v17 }
  0x45   : > { %v431_v35 = vadd.f32 %v430_v25, %v429_v18  ;;  %v458_v37 = vadd.f32 %v457_v26, %v456_v19  ;;  %v484_v39 = vrot.slane %v483_v27, 1  ;;  %v495_v40 = vrot.slane %v494_v28, 1 }
  0x46   : > { %v442_v41 = vadd.f32 %v441_v30, %v440_v16  ;;  %v469_v42 = vadd.f32 %v468_v32, %v467_v22  ;;  %v509_v44 = vrot.slane %v508_v33, 2  ;;  %v520_v45 = vrot.slane %v519_v34, 2 }
  0x47   : > { %v432_v46 = vadd.f32 %v431_v35, %v422_v29  ;;  %v459_v47 = vadd.f32 %v458_v37, %v450_v31  ;;  %v485_v49 = vadd.f32 %v484_v39, %v483_v27  ;;  %v496_v51 = vadd.f32 %v495_v40, %v494_v28 }
  0x48   : > { %v443_v52 = vadd.f32 %v442_v41, %v434_v36  ;;  %v470_v53 = vadd.f32 %v469_v42, %v461_v38  ;;  %v510_v54 = vadd.f32 %v509_v44, %v508_v33  ;;  %v521_v55 = vadd.f32 %v520_v45, %v519_v34 }
  0x49   : > { %433 = vst [vmem:[%s855_s28] sm:$0x1] %v432_v46  ;;  %v486_v56 = vadd.f32 %v485_v49, %v477_v43  ;;  %v532_v57 = vsel %vm424_vm4, %v909_v48, 0.0  ;;  %v497_v58 = vadd.f32 %v496_v51, %v488_v50 }
  0x4a   : > { %444 = vst [vmem:[%s860_s6] sm:$0x1] %v443_v52  ;;  %v511_v59 = vrot.slane %v510_v54, 1  ;;  %v522_v60 = vrot.slane %v521_v55, 1  ;;  %v533_v61 = vrot.slane %v532_v57, 4 }
  0x4b   : > { %460 = vst [vmem:[%s855_s28 + $0x1] sm:$0x1] %v459_v47 }
  0x4c   : > { %471 = vst [vmem:[%s860_s6 + $0x1] sm:$0x1] %v470_v53  ;;  %v512_v0 = vadd.f32 %v511_v59, %v510_v54  ;;  %v523_v1 = vadd.f32 %v522_v60, %v521_v55  ;;  %v534_v2 = vadd.f32 %v533_v61, %v532_v57 }
  0x4d   : > { %487 = vst [vmem:[%s855_s28 + $0x2] sm:$0x1] %v486_v56 }
  0x4e   : > { %498 = vst [vmem:[%s860_s6 + $0x2] sm:$0x1] %v497_v58  ;;  %v513_v3 = vadd.f32 %v512_v0, %v504_v62  ;;  %v524_v48 = vadd.f32 %v523_v1, %v515_v63  ;;  %v535_v4 = vrot.slane %v534_v2, 2 }
  0x50   : > { %514 = vst [vmem:[%s855_s28 + $0x3] sm:$0x1] %v513_v3  ;;  %v536_v5 = vadd.f32 %v535_v4, %v534_v2 }
  0x51   : > { %525 = vst [vmem:[%s860_s6 + $0x3] sm:$0x1] %v524_v48 }
  0x52   : > { %v537_v6 = vrot.slane %v536_v5, 1 }
  0x54   : > { %v538_v8 = vadd.f32 %v537_v6, %v536_v5 }
  0x56   : > { %v539_v9 = vadd.f32 %v538_v8, %v531_v7 }
  0x58   : > { %540 = vst [vmem:[%s850_s25] sm:$0x1] %v539_v9 }
  0x59 PF: > { %s16_s20 = sadd.s32 1, %s792_s20   ;;  %s962_s18 = smov %s788_s19 }
  0x5a   : > { %p13_p5 = scmp.ge.s32.totalorder %s16_s20, 4   ;;  %s963_s19 = smov %s965_s21 }
  0x5c   :  { %15 = sbr.rel (!%p13_p5) target bundleno = 2 (0x2), region = 99 }

</bundles_post_ra>
